<compile_context>
chip_gen: v7x
topology: tpu7x:2x2x1
jax: 0.10.0
libtpu: 0.0.40
codegen_flags: <defaults>
</compile_context>

<pallas_src>
from typing import NamedTuple

import jax
import jax.numpy as jnp
from jax.experimental import pallas as pl
from jax.experimental.pallas import tpu as pltpu


def _round_up(x: int, m: int) -> int:
    return ((x + m - 1) // m) * m


def _cdiv(a: int, b: int) -> int:
    return (a + b - 1) // b


def _spec(block_shape, index_map, *, buffer_count=None):
    """BlockSpec helper; requests single/multi buffering when supported."""
    if buffer_count is None:
        return pl.BlockSpec(block_shape, index_map)
    try:
        return pl.BlockSpec(block_shape, index_map,
                            pipeline_mode=pl.Buffered(buffer_count))
    except TypeError:
        # Older BlockSpec signature without pipeline_mode; default buffering.
        return pl.BlockSpec(block_shape, index_map)


class PreparedLinear(NamedTuple):
    w: jax.Array      # (n_gene_pad, n_tf_pad), transposed + zero-padded
    b: jax.Array      # (1, n_tf_pad) float32
    n_tf: int
    n_gene: int
    tk: int           # K tile (divides n_gene_pad exactly)


def _make_linear_kernel(w_resident: bool, tk: int):
    def kernel(x_ref, w_ref, b_ref, o_ref):
        # x_ref: (tile_n, tk)
        # w_ref: (n_gene_pad, n_tf_pad) if resident else (tk, n_tf_pad)
        # b_ref: (1, n_tf_pad) f32
        # o_ref: (tile_n, n_tf_pad) f32 -- block index constant across k, so it
        #        stays resident in VMEM and doubles as the accumulator.
        k = pl.program_id(1)

        if w_resident:
            start = pl.multiple_of(k * tk, 128)
            w_blk = w_ref[pl.ds(start, tk), :]
        else:
            w_blk = w_ref[...]

        partial = jnp.dot(x_ref[...], w_blk, preferred_element_type=jnp.float32)

        @pl.when(k == 0)
        def _():
            o_ref[...] = partial + b_ref[...]

        @pl.when(k > 0)
        def _():
            o_ref[...] += partial

    return kernel


def prepare_linear_params(weight, bias, *, compute_dtype=jnp.float32,
                          tk_max=2048) -> PreparedLinear:
    """One-time conversion of nn.Linear params into the kernel layout.

    weight: (n_TF, n_gene) PyTorch convention; bias: (n_TF,).
    Do this once outside the hot forward path (no per-call transpose).
    """
    weight = jnp.asarray(weight)
    bias = jnp.asarray(bias)
    n_tf, n_gene = weight.shape

    n_tf_pad = _round_up(n_tf, 128)
    itemsize = jnp.dtype(compute_dtype).itemsize

    # Cap the K tile so a streamed (tk, n_tf_pad) weight block stays ~<=4 MiB.
    tk_cap = ((4 << 20) // (n_tf_pad * itemsize)) // 128 * 128
    tk_max = max(128, min(tk_max, max(128, tk_cap)))

    # Genes padded to 128, then to nK*tk with tk = cdiv balance (adds at most
    # 128*(nK-1) columns -- far tighter than rounding to a fixed 512).
    n_gene_128 = _round_up(n_gene, 128)
    nk = _cdiv(n_gene_128, tk_max)
    tk = _cdiv(n_gene_128 // 128, nk) * 128
    n_gene_pad = nk * tk

    w = jnp.zeros((n_gene_pad, n_tf_pad), compute_dtype)
    w = w.at[:n_gene, :n_tf].set(weight.T.astype(compute_dtype))
    b = jnp.zeros((1, n_tf_pad), jnp.float32)
    b = b.at[0, :n_tf].set(bias.astype(jnp.float32))
    return PreparedLinear(w=w, b=b, n_tf=n_tf, n_gene=n_gene, tk=tk)


def linear_forward(x, params: PreparedLinear, *, tile_n_target=256,
                   vmem_budget_bytes=28 << 20):
    """y = x @ weight.T + bias (nn.Linear semantics), using prepared params."""
    n, n_gene = x.shape
    assert n_gene == params.n_gene, "x gene dim does not match prepared weight"
    n_gene_pad, n_tf_pad = params.w.shape
    tk = params.tk
    nk = n_gene_pad // tk

    # ---- batch tiling: cdiv-balanced tiles (<8 padded rows each); split
    # small batches into >=2 tiles so v7x's second TensorCore has work. ----
    t = max(1, _cdiv(n, tile_n_target))
    if t == 1 and n >= 16:
        t = 2
    tile_n = max(8, _round_up(_cdiv(n, t), 8))
    n_pad = t * tile_n

    # ---- regime selection & VMEM budgeting (conservative: assume every
    # block double-buffered even where we request Buffered(1)). ----
    w_itemsize = params.w.dtype.itemsize
    x_itemsize = w_itemsize
    w_bytes = params.w.size * w_itemsize
    common = 2 * tile_n * tk * x_itemsize + 2 * tile_n * n_tf_pad * 4 + 2 * n_tf_pad * 4
    resident_ws = 2 * w_bytes + common
    streamed_ws = 2 * tk * n_tf_pad * w_itemsize + common
    w_resident = resident_ws <= vmem_budget_bytes
    ws = resident_ws if w_resident else streamed_ws
    vmem_limit = int(min(40 << 20, max(20 << 20, ws + (8 << 20))))

    # ---- cast/pad x only when required (avoid an extra full HBM pass) ----
    x_c = x if x.dtype == params.w.dtype else x.astype(params.w.dtype)
    if (n_pad, n_gene_pad) != (n, n_gene):
        # Zero padding keeps padded rows/genes inert in the accumulator.
        x_c = jnp.pad(x_c, ((0, n_pad - n), (0, n_gene_pad - n_gene)))

    if w_resident:
        # Constant block index => DMA'd from HBM exactly once; single buffer.
        w_spec = _spec((n_gene_pad, n_tf_pad), lambda i, k: (0, 0), buffer_count=1)
    else:
        w_spec = pl.BlockSpec((tk, n_tf_pad), lambda i, k: (k, 0))
    b_spec = _spec((1, n_tf_pad), lambda i, k: (0, 0), buffer_count=1)

    flops = 2 * n_pad * n_gene_pad * n_tf_pad
    bytes_accessed = (n_pad * n_gene_pad * x_itemsize
                      + w_bytes * (1 if w_resident else t)
                      + n_tf_pad * 4
                      + n_pad * n_tf_pad * 4)

    y_full = pl.pallas_call(
        _make_linear_kernel(w_resident, tk),
        out_shape=jax.ShapeDtypeStruct((n_pad, n_tf_pad), jnp.float32),
        grid_spec=pltpu.PrefetchScalarGridSpec(
            num_scalar_prefetch=0,
            grid=(t, nk),
            in_specs=[
                pl.BlockSpec((tile_n, tk), lambda i, k: (i, k)),
                w_spec,
                b_spec,
            ],
            out_specs=pl.BlockSpec((tile_n, n_tf_pad), lambda i, k: (i, 0)),
        ),
        compiler_params=pltpu.CompilerParams(
            dimension_semantics=("parallel", "arbitrary"),
            vmem_limit_bytes=vmem_limit,
        ),
        cost_estimate=pl.CostEstimate(
            flops=int(flops), transcendentals=0,
            bytes_accessed=int(bytes_accessed)),
    )(x_c, params.w, params.b)

    if (n_pad, n_tf_pad) != (n, params.n_tf):
        y_full = y_full[:n, :params.n_tf]
    return y_full


if __name__ == "__main__":
    key = jax.random.PRNGKey(0)

    # ---- Test 1: small shapes consistent with the module. ----
    n_cells, n_gene, n_tf = 16, 64, 32
    kx, kw, kb = jax.random.split(key, 3)
    x = jax.random.normal(kx, (n_cells, n_gene), dtype=jnp.float32)
    bound = 1.0 / (n_gene ** 0.5)
    weight = jax.random.uniform(kw, (n_tf, n_gene), dtype=jnp.float32,
                                minval=-bound, maxval=bound)
    bias = jax.random.uniform(kb, (n_tf,), dtype=jnp.float32,
                              minval=-bound, maxval=bound)

    params = prepare_linear_params(weight, bias)
    y = linear_forward(x, params)
    jax.block_until_ready(y)
    y_ref = x @ weight.T + bias
    assert y.shape == (n_cells, n_tf)
    assert jnp.allclose(y, y_ref, atol=1e-5, rtol=1e-5)

    # ---- Test 2: non-aligned shapes (37 cells, 700 genes -> padded to 768,
    # 50 TFs) exercise batch/gene padding and the output slice. ----
    n2, g2, t2 = 37, 700, 50
    k2x, k2w, k2b = jax.random.split(jax.random.PRNGKey(1), 3)
    x2 = jax.random.normal(k2x, (n2, g2), dtype=jnp.float32)
    w2 = jax.random.uniform(k2w, (t2, g2), dtype=jnp.float32, minval=-0.05, maxval=0.05)
    b2 = jax.random.uniform(k2b, (t2,), dtype=jnp.float32, minval=-0.05, maxval=0.05)
    p2 = prepare_linear_params(w2, b2)
    y2 = linear_forward(x2, p2)
    jax.block_until_ready(y2)
    y2_ref = x2 @ w2.T + b2
    assert y2.shape == (n2, t2)
    assert jnp.allclose(y2, y2_ref, atol=1e-4, rtol=1e-4)

    # ---- Test 3: larger gene panel (4000 genes -> nk=2 K steps) exercises
    # the resident-weight path with in-kernel K slicing + accumulation. ----
    n3, g3, t3 = 40, 4000, 30
    k3x, k3w, k3b = jax.random.split(jax.random.PRNGKey(2), 3)
    x3 = jax.random.normal(k3x, (n3, g3), dtype=jnp.float32)
    w3 = jax.random.uniform(k3w, (t3, g3), dtype=jnp.float32, minval=-0.02, maxval=0.02)
    b3 = jax.random.uniform(k3b, (t3,), dtype=jnp.float32, minval=-0.02, maxval=0.02)
    p3 = prepare_linear_params(w3, b3)
    y3 = linear_forward(x3, p3)
    jax.block_until_ready(y3)
    y3_ref = x3 @ w3.T + b3
    assert jnp.allclose(y3, y3_ref, atol=1e-4, rtol=1e-4)

    # ---- Test 4: same data with a tiny VMEM budget forces the streamed
    # (K-tiled, double-buffered weight) regime. ----
    y4 = linear_forward(x3, p3, vmem_budget_bytes=1 << 20)
    jax.block_until_ready(y4)
    assert jnp.allclose(y4, y3_ref, atol=1e-4, rtol=1e-4)

    print("KERNEL_OK")
</pallas_src>

<mosaic_0001>
module attributes {stable_mosaic.version = 11 : i64} {
  func.func @kernel(%arg0: i32, %arg1: i32, %arg2: memref<8x128xf32, #tpu.memory_space<vmem>>, %arg3: memref<128x128xf32, #tpu.memory_space<vmem>>, %arg4: memref<1x128xf32, #tpu.memory_space<vmem>>, %arg5: memref<8x128xf32, #tpu.memory_space<vmem>>) attributes {dimension_semantics = [#tpu.dimension_semantics<parallel>, #tpu.dimension_semantics<arbitrary>], iteration_bounds = array<i64: 2, 1>, scalar_prefetch = 0 : i64, scratch_operands = 0 : i64, tpu.core_type = #tpu.core_type<tc>, window_params = [{transform_indices = @transform_0, window_bounds = array<i64: 8, 128>}, {pipeline_mode = #tpu.pipeline_mode<synchronous>, transform_indices = @transform_1, window_bounds = array<i64: 128, 128>}, {pipeline_mode = #tpu.pipeline_mode<synchronous>, transform_indices = @transform_2, window_bounds = array<i64: 1, 128>}, {transform_indices = @transform_3, window_bounds = array<i64: 8, 128>}]} {
    %c128_i32 = arith.constant 128 : i32
    %0 = arith.muli %arg1, %c128_i32 : i32
    %1 = tpu.assume_multiple %0, 128 : i32
    %2 = arith.index_cast %1 : i32 to index
    %c0 = arith.constant 0 : index
    %3 = vector.load %arg3[%2, %c0] : memref<128x128xf32, #tpu.memory_space<vmem>>, vector<128x128xf32>
    %c0_0 = arith.constant 0 : index
    %c0_1 = arith.constant 0 : index
    %4 = vector.load %arg2[%c0_0, %c0_1] : memref<8x128xf32, #tpu.memory_space<vmem>>, vector<8x128xf32>
    %cst = arith.constant dense<0.000000e+00> : vector<8x128xf32>
    %5 = tpu.matmul %4, %3, %cst {dimension_numbers = #tpu.dot_dimension_numbers<[1], [0], [0], [1], [0, 0, 1, 1], [], []>} : vector<8x128xf32>, vector<128x128xf32>, vector<8x128xf32> -> vector<8x128xf32>
    %c0_i32 = arith.constant 0 : i32
    %6 = arith.cmpi eq, %arg1, %c0_i32 : i32
    %7 = arith.extui %6 : i1 to i32
    %c0_i32_2 = arith.constant 0 : i32
    %8 = arith.cmpi ne, %7, %c0_i32_2 : i32
    scf.if %8 {
      %c0_5 = arith.constant 0 : index
      %c0_6 = arith.constant 0 : index
      %12 = vector.load %arg4[%c0_5, %c0_6] : memref<1x128xf32, #tpu.memory_space<vmem>>, vector<1x128xf32>
      %13 = vector.broadcast %12 : vector<1x128xf32> to vector<8x128xf32>
      %14 = arith.addf %5, %13 : vector<8x128xf32>
      %c0_7 = arith.constant 0 : index
      %c0_8 = arith.constant 0 : index
      %15 = vector.load %arg5[%c0_7, %c0_8] : memref<8x128xf32, #tpu.memory_space<vmem>>, vector<8x128xf32>
      tpu.vector_store %arg5[%c0_7, %c0_8], %14 {strides = array<i32>} : memref<8x128xf32, #tpu.memory_space<vmem>>, vector<8x128xf32>,
    } else {
    }
    %c0_i32_3 = arith.constant 0 : i32
    %9 = arith.cmpi sgt, %arg1, %c0_i32_3 : i32
    %10 = arith.extui %9 : i1 to i32
    %c0_i32_4 = arith.constant 0 : i32
    %11 = arith.cmpi ne, %10, %c0_i32_4 : i32
    scf.if %11 {
      %c0_5 = arith.constant 0 : index
      %c0_6 = arith.constant 0 : index
      %12 = vector.load %arg5[%c0_5, %c0_6] : memref<8x128xf32, #tpu.memory_space<vmem>>, vector<8x128xf32>
      %13 = arith.addf %12, %5 : vector<8x128xf32>
      %c0_7 = arith.constant 0 : index
      %c0_8 = arith.constant 0 : index
      %14 = vector.load %arg5[%c0_7, %c0_8] : memref<8x128xf32, #tpu.memory_space<vmem>>, vector<8x128xf32>
      tpu.vector_store %arg5[%c0_7, %c0_8], %13 {strides = array<i32>} : memref<8x128xf32, #tpu.memory_space<vmem>>, vector<8x128xf32>,
    } else {
    }
    return
  }
  func.func @transform_0(%arg0: i32, %arg1: i32) -> (i32, i32) {
    %c0_i32 = arith.constant 0 : i32
    return %arg0, %arg1 : i32, i32
  }
  func.func @transform_1(%arg0: i32, %arg1: i32) -> (i32, i32) {
    %c0_i32 = arith.constant 0 : i32
    %c0_i32_0 = arith.constant 0 : i32
    %c0_i32_1 = arith.constant 0 : i32
    return %c0_i32, %c0_i32_0 : i32, i32
  }
  func.func @transform_2(%arg0: i32, %arg1: i32) -> (i32, i32) {
    %c0_i32 = arith.constant 0 : i32
    %c0_i32_0 = arith.constant 0 : i32
    %c0_i32_1 = arith.constant 0 : i32
    return %c0_i32, %c0_i32_0 : i32, i32
  }
  func.func @transform_3(%arg0: i32, %arg1: i32) -> (i32, i32) {
    %c0_i32 = arith.constant 0 : i32
    %c0_i32_0 = arith.constant 0 : i32
    return %arg0, %c0_i32 : i32, i32
  }
}

</mosaic_0001>

<bundles_post_ra>
// kernel: tpu_custom_call.1
= control target key start
LH: loop header
LB: loop body
LE: loop exit
PB: predicated region body
PF: predicated region fallthrough
CT: control target
= control target key end

     0   :  { %8 = vsyncpa [#allocation3], 0  ;;  %s998_s0 = inlined_call_operand.hbm [shape: f32[16,128], index: 0, kind: input, shape index: {}]   ;;  %s999_s1 = inlined_call_operand.hbm [shape: f32[128,128], index: 1, kind: input, shape index: {}]   ;;  %s1000_s2 = inlined_call_operand.vmem [shape: f32[1,128], index: 2, kind: input, shape index: {}]   ;;  %s1001_s3 = inlined_call_operand.hbm [shape: f32[16,128], index: 3, kind: output, shape index: {}]  }
   0x1   :  { %10 = vsyncpa [#allocation3 + $0x1], 0 }
   0x2   :  { %11 = vsyncpa [#allocation6], 0 }
   0x3   :  { %12 = vsyncpa [#allocation4], 0 }
   0x4   :  { %14 = vsyncpa [#allocation4 + $0x1], 0  ;;  %s774_s12 = smov 0   ;;  %s776_s13 = smov 0  }
   0x5   :  { %s778_s14 = smov 0   ;;  %s780_s15 = smov 0  }
   0x6   :  { %s782_s16 = smov 0   ;;  %s784_s17 = smov 0  }
   0x7 LB: > { %s430_s18 = sadd.s32 4294967295, %s744_s17   ;;  %s431_s19 = sadd.s32 4294967294, %s744_s17   ;;  %s744_s17 = sphi %s784_s17, %s20_s17   ;;  %s740_s16 = sphi %s782_s16, %s1025_s16   ;;  %s736_s15 = sphi %s780_s15, %s1024_s15   ;;  %s732_s14 = sphi %s778_s14, %s1023_s14   ;;  %s728_s13 = sphi %s776_s13, %s1022_s13   ;;  %s724_s12 = sphi %s774_s12, %s1021_s12  }
   0x8   : > { %p54_p0 = scmp.ne.s32.totalorder %s728_s13, %s724_s12  ;;  %p808_p1 = scmp.eq.s32.totalorder %s430_s18, 0 }
   0x9   : > { %p812_p2 = scmp.eq.s32.totalorder %s430_s18, 1  ;;  %p126_p3 = scmp.eq.s32.totalorder %s431_s19, 1 }
   0xa   : > { %s1006_s20 = scalar_select %p808_p1, 1, 0 }
   0xb   : > { %s1007_s21 = scalar_select %p812_p2, 1, 0 }
   0xc   : > { %p818_p4 = por %p808_p1, %p54_p0  ;;  %p432_p5 = scmp.ge.s32.totalorder %s744_s17, 1 }
   0xd   : > { %p823_p6 = por %p126_p3, %p54_p0  ;;  %p133_p7 = scmp.lt.s32.totalorder %s744_s17, 3 }
   0xe   : > { %s1008_s22 = scalar_select %p818_p4, 1, 0 }
   0xf   : > { %s1009_s23 = scalar_select %p823_p6, 1, 0 }
  0x10   : > { %p828_p8 = pnand %p432_p5, %p133_p7  ;;  %s746_s25 = smov [#allocation5]  }
  0x11   : > { %s145_s26 = sshll.u32 %s746_s25, 4  ;;  %s32_s28 = sadd.s32 1, %s740_s16  ;;  %s146_s26 = int_to_ptr.vmem [resolvable:$true] %s145_s26 }
  0x12   : > { %s1010_s24 = scalar_select %p828_p8, 1, 0 }
  0x13   : > { %p530_p9 = pneg %p828_p8  ;;  %s600_s4 = scalar_lea.hbm %s999_s1, 2048 }
  0x14   : > { %p601_p12 = scmp.ne.s32.totalorder %s999_s1, %s600_s4  ;;  %p607_p5 = scmp.lt.u32.totalorder %s600_s4, %s999_s1 }
  0x15   : > { %p837_p11 = pnand %p530_p9, %p808_p1 }
  0x17   : > { %p602_p13 = pneg %p837_p11 }
  0x19   : > { %p603_p0 = pnand %p602_p13, %p601_p12 }
  0x1b   : > { %p604_p3 = pneg %p603_p0 }
  0x1d   : > { %p609_p7 = pnand %p607_p5, %p604_p3 }
  0x1f   : > { %612 = shalt.err (!%p609_p7)
}
  0x20   : > { %s613_s9 = scalar_lea.vmem %s146_s26, 2048  ;;  %p621_p1 = scmp.lt.s32.totalorder %s146_s26, %s146_s26 }
  0x21   : > { %p614_p9 = scmp.ne.s32.totalorder %s146_s26, %s613_s9  ;;  %p622_p4 = scmp.lt.s32.totalorder %s613_s9, %s613_s9 }
  0x23   : > { %p616_p10 = pnand %p614_p9, %p602_p13  ;;  %p623_p8 = por %p622_p4, %p621_p1 }
  0x25   : > { %p617_p6 = pneg %p616_p10 }
  0x27   : > { %p624_p2 = pnand %p623_p8, %p617_p6 }
  0x29   : > { %627 = shalt.err (!%p624_p2)
}
  0x2a   : > { %s747_s10 = smov 128   ;;  %s748_s11 = smov 8  }
  0x2b   : > { %533 = dma.hbm_to_vmem [thread:$0]  (!%p837_p11), %s999_s1, 2048, %s146_s26, [#allocation6], %s747_s10, %s747_s10, %s748_s11  }
  0x2c   : > { %p34_p1 = scmp.ge.s32.totalorder %s32_s28, 2  ;;  %s41_s25 = sadd.s32 1, %s732_s14 }
  0x2d   : > { %p48_p2 = scmp.ne.s32.totalorder %s732_s14, %s728_s13  ;;  %p49_p4 = scmp.eq.s32.totalorder %s744_s17, 0 }
  0x2e   : > { %s1027_s28 = smov (%p34_p1, %s32_s28), 0  ;;  %p1013_p8 = scmp.ne.s32.totalorder %s1007_s21, 0 }
  0x2f   : > { %p864_p6 = por %p49_p4, %p48_p2  ;;  %s36_s27 = ssub.s32 %s740_s16, %s1027_s28 }
  0x30   : > { %p870_p10 = por %p1013_p8, %p48_p2  ;;  %p543_p12 = scmp.lt.s32.totalorder %s744_s17, 2 }
  0x31   : > { %p39_p11 = scmp.eq.s32.totalorder %s36_s27, 0  ;;  %s162_s26 = sand.u32 1, %s732_s14  }
  0x32   : > { %s435_s4 = sshll.u32 %s162_s26, 3  ;;  %s436_s6 = sshll.u32 %s740_s16, 7 }
  0x33   : > { %s879_s5 = scalar_select %p39_p11, %s732_s14, %s41_s25  }
  0x34   : > { %s885_s9 = scalar_lea.hbm %s998_s0, %s436_s6  ;;  %s166_s21 = scalar_lea.vmem [#allocation2], %s435_s4 }
  0x35   : > { %s174_s10 = sshll.u32 %s166_s21, 4  ;;  %p891_p13 = pnand %p543_p12, %p864_p6  ;;  %s887_s10 = int_to_ptr.vmem [resolvable:$true] %s174_s10 }
  0x36   : > { %s163_s18 = scalar_lea.sflag [#allocation3], %s162_s26  ;;  %s628_s19 = scalar_lea.hbm %s885_s9, 128 }
  0x37   : > { %p629_p0 = scmp.ne.s32.totalorder %s885_s9, %s628_s19  ;;  %p630_p3 = pneg %p891_p13 }
  0x38   : > { %s633_s4 = scalar_lea.hbm %s998_s0, 256  ;;  %p634_p9 = scmp.lt.u32.totalorder %s885_s9, %s998_s0 }
  0x39   : > { %p631_p5 = pnand %p630_p3, %p629_p0  ;;  %p635_p1 = scmp.lt.u32.totalorder %s633_s4, %s628_s19 }
  0x3a   : > { %p637_p4 = scmp.lt.u32.totalorder %s628_s19, %s885_s9 }
  0x3b   : > { %p632_p7 = pneg %p631_p5  ;;  %p636_p2 = por %p635_p1, %p634_p9 }
  0x3d   : > { %p638_p6 = por %p637_p4, %p636_p2 }
  0x3f   : > { %p639_p8 = pnand %p638_p6, %p632_p7 }
  0x41   : > { %642 = shalt.err (!%p639_p8)
}
  0x42   : > { %s643_s26 = scalar_lea.vmem %s887_s10, 128  ;;  %s749_s7 = smov [#allocation2]  }
  0x43   : > { %p644_p12 = scmp.ne.s32.totalorder %s887_s10, %s643_s26  ;;  %s648_s8 = sshll.u32 %s749_s7, 4  ;;  %s649_s8 = int_to_ptr.vmem [resolvable:$false] %s648_s8 }
  0x44   : > { %s650_s21 = scalar_lea.vmem %s649_s8, 256  ;;  %p651_p5 = scmp.lt.s32.totalorder %s887_s10, %s649_s8 }
  0x45   : > { %p646_p11 = pnand %p644_p12, %p630_p3  ;;  %p652_p9 = scmp.lt.s32.totalorder %s650_s21, %s643_s26 }
  0x47   : > { %p647_p0 = pneg %p646_p11  ;;  %p653_p1 = por %p652_p9, %p651_p5 }
  0x49   : > { %p654_p2 = pnand %p653_p1, %p647_p0 }
  0x4b   : > { %657 = shalt.err (!%p654_p2)
}
  0x4c   : > { %537 = dma.hbm_to_vmem [thread:$0]  (!%p891_p13), %s885_s9, 128, %s887_s10, %s163_s18  }
  0x4d   : > { %p1016_p7 = scmp.ne.s32.totalorder %s1010_s24, 0 }
  0x4e   : > { %s923_s19 = sand.u32 (!%p1016_p7), 1, %s728_s13   ;;  %p1017_p3 = scmp.ne.s32.totalorder (!%p1016_p7), %s1008_s22, 0 }
  0x4f   : > { %183 = sbr.rel (%p1016_p7) target bundleno = 353 (0x161), region = 32  ;;  %s438_s25 = sshll.u32 (!%p1016_p7), %s923_s19, 3 }
  0x50   : > { %s186_s27 = scalar_lea.sflag (!%p1016_p7), [#allocation3], %s923_s19  ;;  %s929_s4 = scalar_lea.vmem (!%p1016_p7), [#allocation2], %s438_s25 }
  0x56   : > { %711 = dma.done.wait (%p1017_p3), %s186_s27, 128  }
  0x57   : > { %713 = vsyncadd (%p1017_p3), %s186_s27, 4294967168  ;;  %p1018_p13 = scmp.ne.s32.totalorder %s1006_s20, 0 }
  0x59   : > { %715 = dma.done.wait (%p1018_p13), [#allocation6], 2048  }
  0x5a   : > { %717 = vsyncadd (%p1018_p13), [#allocation6], 4294965248  ;;  %v750_v0 = vmov 0.0|0.0   ;;  %vm751_vm0 = vmmov 0   ;;  %v752_v1 = vmov 0.0   ;;  %v218_v2 = vld [vmem:[#allocation5] sm:$0xff] }
  0x5b   : > { %498 = vmatprep.subr.bf16.mxu0 %v750_v0  ;;  %495 = vmatprep.mubr.msk.f32.mxu0 %vm751_vm0, %v752_v1  ;;  %v219_v3 = vld [vmem:[#allocation5 + $0x8] sm:$0xff]  ;;  %v220_v4 = vld [vmem:[#allocation5 + $0x10] sm:$0xff]  ;;  %v221_v6 = vld [vmem:[#allocation5 + $0x18] sm:$0xff]  ;;  %s443_s24 = sshll.u32 %s736_s15, 7  ;;  %s215_s9 = scalar_lea.vmem [#allocation7], %s438_s25 }
  0x5c   : > { %v499_v5 = vpack.c.bf16 %v219_v3, %v218_v2  ;;  %v502_v7 = vpack.c.bf16 %v221_v6, %v220_v4  ;;  %v222_v8 = vld [vmem:[#allocation5 + $0x20] sm:$0xff]  ;;  %v223_v9 = vld [vmem:[#allocation5 + $0x28] sm:$0xff]  ;;  %v224_v11 = vld [vmem:[#allocation5 + $0x30] sm:$0xff]  ;;  %s339_s10 = sshll.u32 %s215_s9, 4  ;;  %s949_s29 = scalar_lea.hbm %s1001_s3, %s443_s24  ;;  %s951_s10 = int_to_ptr.vmem [resolvable:$true] %s339_s10 }
  0x5d   : > { %v505_v10 = vpack.c.bf16 %v223_v9, %v222_v8  ;;  %v225_v12 = vld [vmem:[#allocation5 + $0x38] sm:$0xff]  ;;  %v226_v14 = vld [vmem:[#allocation5 + $0x40] sm:$0xff]  ;;  %v227_v15 = vld [vmem:[#allocation5 + $0x48] sm:$0xff]  ;;  %s326_s6 = scalar_lea.sflag [#allocation4], %s923_s19  ;;  %s658_s26 = scalar_lea.vmem %s951_s10, 128 }
  0x5e   : > { %500 = vmatpush3.bf16.msra.mxu0 %v499_v5  ;;  %v508_v13 = vpack.c.bf16 %v225_v12, %v224_v11  ;;  %v511_v16 = vpack.c.bf16 %v227_v15, %v226_v14  ;;  %v228_v17 = vld [vmem:[#allocation5 + $0x50] sm:$0xff]  ;;  %v229_v18 = vld [vmem:[#allocation5 + $0x58] sm:$0xff]  ;;  %v230_v20 = vld [vmem:[#allocation5 + $0x60] sm:$0xff]  ;;  %p659_p4 = scmp.ne.s32.totalorder %s951_s10, %s658_s26  ;;  %s753_s15 = smov [#allocation7]  }
  0x5f   : > { %501 = vmatprep.subr.bf16.mxu0 %v750_v0  ;;  %v514_v19 = vpack.c.bf16 %v229_v18, %v228_v17  ;;  %v231_v21 = vld [vmem:[#allocation5 + $0x68] sm:$0xff]  ;;  %v232_v23 = vld [vmem:[#allocation5 + $0x70] sm:$0xff]  ;;  %v233_v24 = vld [vmem:[#allocation5 + $0x78] sm:$0xff]  ;;  %s662_s7 = sshll.u32 %s753_s15, 4  ;;  %s663_s7 = int_to_ptr.vmem [resolvable:$false] %s662_s7 }
  0x60   : > { %v517_v22 = vpack.c.bf16 %v231_v21, %v230_v20  ;;  %v520_v25 = vpack.c.bf16 %v233_v24, %v232_v23  ;;  %v234_v26 = vld [vmem:[%s929_s4] sm:$0xff]  ;;  %p660_p6 = pnand %p659_p4, %p870_p10  ;;  %s664_s8 = scalar_lea.vmem %s663_s7, 256 }
  0x61   : > { %v441_v27 = vld [vmem:[%s1000_s2] ss:$0 sm:$0xff]  ;;  %p665_p12 = scmp.lt.s32.totalorder %s951_s10, %s663_s7  ;;  %p666_p11 = scmp.lt.s32.totalorder %s664_s8, %s658_s26 }
  0x62   : > { %503 = vmatpush3.bf16.msra.mxu0 %v502_v7  ;;  %p661_p8 = pneg %p660_p6 }
  0x63   : > { %504 = vmatprep.subr.bf16.mxu0 %v750_v0  ;;  %p667_p0 = por %p666_p11, %p665_p12 }
  0x65   : > { %p668_p5 = pnand %p667_p0, %p661_p8 }
  0x66   : > { %506 = vmatpush3.bf16.msra.mxu0 %v505_v10 }
  0x67   : > { %507 = vmatprep.subr.bf16.mxu0 %v750_v0 }
  0x6a   : > { %509 = vmatpush3.bf16.msra.mxu0 %v508_v13 }
  0x6b   : > { %510 = vmatprep.subr.bf16.mxu0 %v750_v0 }
  0x6e   : > { %512 = vmatpush3.bf16.msra.mxu0 %v511_v16 }
  0x6f   : > { %513 = vmatprep.subr.bf16.mxu0 %v750_v0 }
  0x72   : > { %515 = vmatpush3.bf16.msra.mxu0 %v514_v19 }
  0x73   : > { %516 = vmatprep.subr.bf16.mxu0 %v750_v0 }
  0x76   : > { %518 = vmatpush3.bf16.msra.mxu0 %v517_v22 }
  0x77   : > { %519 = vmatprep.subr.bf16.mxu0 %v750_v0 }
  0x7a   : > { %521 = vmatpush3.bf16.msra.mxu0 %v520_v25 }
  0x7d   : > { %496 = vmatmul.mubr.f32.vlgmr.msra.gmra.mrb[0].mxu0 %v234_v26 }
 0x150   : > { %v301_v28 = vpop.f32.mrb[0].mxu0 }
 0x151   : > { %v316_v29 = vadd.f32 %v441_v27, %v301_v28  ;;  %v497_v30 = vpop.f32.mrb[1].mxu0 }
 0x153   : > { %317 = vst [vmem:[%s215_s9] sm:$0xff] %v316_v29 }
 0x154   : > { %671 = shalt.err (!%p668_p5)
}
 0x155   : > { %s672_s21 = scalar_lea.hbm %s949_s29, 128  ;;  %s676_s27 = scalar_lea.hbm %s1001_s3, 256 }
 0x156   : > { %p673_p9 = scmp.ne.s32.totalorder %s949_s29, %s672_s21  ;;  %p677_p7 = scmp.lt.u32.totalorder %s949_s29, %s1001_s3 }
 0x157   : > { %p678_p3 = scmp.lt.u32.totalorder %s676_s27, %s672_s21  ;;  %p680_p4 = scmp.lt.u32.totalorder %s672_s21, %s949_s29 }
 0x158   : > { %p674_p1 = pnand %p673_p9, %p870_p10 }
 0x159   : > { %p679_p13 = por %p678_p3, %p677_p7 }
 0x15a   : > { %p675_p2 = pneg %p674_p1 }
 0x15b   : > { %p681_p6 = por %p680_p4, %p679_p13 }
 0x15d   : > { %p682_p8 = pnand %p681_p6, %p675_p2 }
 0x15f   : > { %685 = shalt.err (!%p682_p8)
}
 0x160   : > { %528 = dma.vmem_to_hbm [thread:$0]  (%p870_p10), %s951_s10, 128, %s949_s29, %s326_s6  }
 0x161 PF: > { %s351_s22 = sand.u32 1, %s724_s12   ;;  %p1019_p12 = scmp.ne.s32.totalorder %s1009_s23, 0 }
 0x162   : > { %p1020_p11 = scmp.ge.s32.totalorder %s744_s17, 2  ;;  %s352_s24 = scalar_lea.sflag [#allocation4], %s351_s22 }
 0x164   : > { %p539_p0 = pnand %p1020_p11, %p1019_p12 }
 0x166   : > { %719 = dma.done.wait (!%p539_p0), %s352_s24, 128  }
 0x167   : > { %721 = vsyncadd (!%p539_p0), %s352_s24, 4294967168  ;;  %s20_s17 = sadd.s32 1, %s744_s17   ;;  %s1021_s12 = smov %s728_s13 }
 0x168   : > { %p17_p5 = scmp.ge.s32.totalorder %s20_s17, 4   ;;  %s1022_s13 = smov %s732_s14 }
 0x169   : > { %s1023_s14 = smov %s879_s5  ;;  %s1024_s15 = smov %s740_s16 }
 0x16a   : > { %s1025_s16 = smov %s1027_s28  ;;  %19 = sbr.rel (!%p17_p5) target bundleno = 7 (0x7), region = 90 }
 0x171   :  { %357 = vsyncpa [#allocation3], 1 }
 0x172   :  { %359 = vsyncpa [#allocation3 + $0x1], 1 }
 0x173   :  { %360 = vsyncpa [#allocation6], 1 }
 0x174   :  { %361 = vsyncpa [#allocation4], 1 }
 0x175   :  { %363 = vsyncpa [#allocation4 + $0x1], 1 }

</bundles_post_ra>
